<compile_context>
chip_gen: v5e
topology: v5e:2x2
jax: 0.10.0
libtpu: 0.0.40
codegen_flags: <defaults>
</compile_context>

<pallas_src>
import jax
import jax.numpy as jnp
from jax.experimental import pallas as pl
from jax.experimental.pallas import tpu as pltpu


# ----------------------------------------------------------------------------
# Kernel: transposed (batch-on-lanes) 2-layer MLP + fused mu/logvar head.
#   x_ref  : [C,  tile_b]   covariates^T
#   w*_ref : [out, in]      transposed weights (precomputed in prepare_params)
#   b*_ref : [out, 1]       f32 column biases (broadcast across lanes)
#   out_ref: [2L, tile_b]   fused [mu; logvar]^T slab (lane-dense)
# ----------------------------------------------------------------------------
def _prior_net_kernel(x_ref,
                      w1_ref, b1_ref,
                      w2_ref, b2_ref,
                      wh_ref, bh_ref,
                      out_ref):
    # shared hidden layer 1: Linear + ReLU (f32 accumulation on the MXU)
    h = jnp.dot(w1_ref[...], x_ref[...],
                preferred_element_type=jnp.float32) + b1_ref[...]
    h = jnp.maximum(h, 0.0)
    # shared hidden layer 2: Linear + ReLU
    h = jnp.dot(w2_ref[...], h.astype(w2_ref.dtype),
                preferred_element_type=jnp.float32) + b2_ref[...]
    h = jnp.maximum(h, 0.0)
    # fused mu/logvar head: one matmul, one full-lane-width store
    out = jnp.dot(wh_ref[...], h.astype(wh_ref.dtype),
                  preferred_element_type=jnp.float32) + bh_ref[...]
    out_ref[...] = out.astype(out_ref.dtype)


# ----------------------------------------------------------------------------
# One-time parameter preparation (hoisted out of the forward path).
# ----------------------------------------------------------------------------
def prepare_params(params, compute_dtype=jnp.float32):
    """params: [(w1,b1),(w2,b2),(wmu,bmu),(wlv,blv)], each w as [in, out],
    each b as [1, out] (i.e. transpose of PyTorch nn.Linear.weight).
    Returns prepared (transposed / fused / cast) tensors for the kernel."""
    (w1, b1), (w2, b2), (wmu, bmu), (wlv, blv) = params
    latent_dim = wmu.shape[1]
    # fuse heads along the output axis, then transpose everything to [out, in]
    w_head = jnp.concatenate([wmu, wlv], axis=1)          # [H2, 2L]
    b_head = jnp.concatenate([bmu, blv], axis=1)           # [1, 2L]
    wt1 = jnp.asarray(w1).T.astype(compute_dtype)           # [H1, C]
    wt2 = jnp.asarray(w2).T.astype(compute_dtype)           # [H2, H1]
    wth = w_head.T.astype(compute_dtype)                    # [2L, H2]
    # biases stay f32: they add onto the f32 MXU accumulator
    b1c = jnp.asarray(b1).reshape(-1, 1).astype(jnp.float32)   # [H1, 1]
    b2c = jnp.asarray(b2).reshape(-1, 1).astype(jnp.float32)   # [H2, 1]
    bhc = b_head.reshape(-1, 1).astype(jnp.float32)            # [2L, 1]
    return (wt1, b1c, wt2, b2c, wth, bhc, latent_dim)


def _round_up(x, m):
    return ((x + m - 1) // m) * m


def _num_tensorcores():
    """2 tiles on dual-TC v7x, 1 everywhere else (v5e/v6e are single-TC)."""
    try:
        kind = jax.devices()[0].device_kind.lower()
        if "v7" in kind or "7x" in kind:
            return 2
    except Exception:
        pass
    return 1


# ----------------------------------------------------------------------------
# Forward pass.
# ----------------------------------------------------------------------------
def covariate_prior_net(covariates, prepared, *, num_batch_tiles=None):
    """covariates: [B, num_covariates] -> (mu, logvar), each [B, latent_dim]."""
    wt1, b1c, wt2, b2c, wth, bhc, L = prepared
    B, C = covariates.shape
    H1 = wt1.shape[0]
    H2 = wt2.shape[0]
    L2 = wth.shape[0]
    assert wt1.shape[1] == C and L2 == 2 * L

    # ---- grid / batch-tile selection ---------------------------------------
    if num_batch_tiles is None:
        tcs = _num_tensorcores()
        # only split when each tile still gets >=1 full 128-lane block of real
        # rows; on single-TC chips extra grid steps are pure serial overhead.
        num_batch_tiles = tcs if B > 128 else 1
    per_tile = pl.cdiv(B, num_batch_tiles)
    # batch sits on the 128-lane axis -> tile must be a lane multiple; use a
    # 256 multiple for larger tiles so one tile is a full v6e/v7x MXU pass.
    mult = 256 if per_tile >= 256 else 128
    tile_b = _round_up(per_tile, mult)
    grid_b = num_batch_tiles
    B_pad = grid_b * tile_b

    # ---- transpose + pad covariates (batch onto lanes) ---------------------
    x_t = covariates.astype(wt1.dtype).T                    # [C, B]
    if B_pad != B:
        # padded columns compute bias-only garbage; sliced away below
        x_t = jnp.pad(x_t, ((0, 0), (0, B_pad - B)))

    def batch_map(i):
        return (0, i)

    def full_map(i):
        return (0, 0)

    out = pl.pallas_call(
        _prior_net_kernel,
        out_shape=jax.ShapeDtypeStruct((L2, B_pad), jnp.float32),
        grid=(grid_b,),
        in_specs=[
            pl.BlockSpec((C, tile_b), batch_map),   # covariates^T (batch-tiled)
            pl.BlockSpec((H1, C), full_map),        # w1^T
            pl.BlockSpec((H1, 1), full_map),        # b1 (column)
            pl.BlockSpec((H2, H1), full_map),       # w2^T
            pl.BlockSpec((H2, 1), full_map),        # b2 (column)
            pl.BlockSpec((L2, H2), full_map),       # fused head weight^T
            pl.BlockSpec((L2, 1), full_map),        # fused head bias (column)
        ],
        out_specs=pl.BlockSpec((L2, tile_b), batch_map),
        compiler_params=pltpu.CompilerParams(
            dimension_semantics=("parallel",)),
    )(x_t, wt1, b1c, wt2, b2c, wth, bhc)

    mu = out[:L, :B].T
    logvar = out[L:, :B].T
    return mu, logvar


# ----------------------------------------------------------------------------
# Reference + init helpers.
# ----------------------------------------------------------------------------
def init_params(key, latent_dim, hidden_dims, num_covariates):
    """Deterministic PyTorch-style init: U(-1/sqrt(fan_in), 1/sqrt(fan_in)).
    Weights stored as [in, out] (transpose of nn.Linear.weight)."""
    dims = [num_covariates] + list(hidden_dims)
    params = []
    for i in range(len(dims) - 1):
        key, kw, kb = jax.random.split(key, 3)
        bound = 1.0 / jnp.sqrt(dims[i])
        w = jax.random.uniform(kw, (dims[i], dims[i + 1]), jnp.float32,
                               -bound, bound)
        b = jax.random.uniform(kb, (1, dims[i + 1]), jnp.float32, -bound, bound)
        params.append((w, b))
    prev = dims[-1]
    for _ in range(2):  # fc_mu, fc_logvar heads
        key, kw, kb = jax.random.split(key, 3)
        bound = 1.0 / jnp.sqrt(prev)
        w = jax.random.uniform(kw, (prev, latent_dim), jnp.float32,
                               -bound, bound)
        b = jax.random.uniform(kb, (1, latent_dim), jnp.float32, -bound, bound)
        params.append((w, b))
    return params


def reference_forward(covariates, params):
    (w1, b1), (w2, b2), (wmu, bmu), (wlv, blv) = params
    h = jnp.maximum(covariates @ w1 + b1, 0.0)
    h = jnp.maximum(h @ w2 + b2, 0.0)
    return h @ wmu + bmu, h @ wlv + blv


if __name__ == "__main__":
    # Shapes implied by the module's forward: covariates [B, num_covariates].
    # B=300 exercises lane padding (300 -> 512) and, when forced, a 2-tile
    # "parallel" grid (the v7x path).
    batch = 300
    num_covariates = 16
    hidden_dims = [32, 32]
    latent_dim = 8

    key = jax.random.PRNGKey(0)
    key, kx = jax.random.split(key)
    covariates = jax.random.normal(kx, (batch, num_covariates), jnp.float32)
    params = init_params(key, latent_dim, hidden_dims, num_covariates)

    mu_ref, lv_ref = reference_forward(covariates, params)

    # f32 path (default), auto grid (1 step on v5e/v6e, 2 on v7x).
    prepared_f32 = prepare_params(params, compute_dtype=jnp.float32)
    mu, logvar = covariate_prior_net(covariates, prepared_f32)
    mu, logvar = jax.block_until_ready((mu, logvar))
    assert mu.shape == (batch, latent_dim)
    assert logvar.shape == (batch, latent_dim)
    assert jnp.allclose(mu, mu_ref, atol=1e-5, rtol=1e-5)
    assert jnp.allclose(logvar, lv_ref, atol=1e-5, rtol=1e-5)

    # Forced 2-tile grid (exercises the dual-TC v7x tiling path everywhere).
    mu2, lv2 = covariate_prior_net(covariates, prepared_f32, num_batch_tiles=2)
    mu2, lv2 = jax.block_until_ready((mu2, lv2))
    assert jnp.allclose(mu2, mu_ref, atol=1e-5, rtol=1e-5)
    assert jnp.allclose(lv2, lv_ref, atol=1e-5, rtol=1e-5)

    # bf16-operand path (f32 accumulation, f32 biases): halves x/weight DMA
    # bytes -- biggest relative win on v5e; tolerance loose for bf16 rounding.
    prepared_bf16 = prepare_params(params, compute_dtype=jnp.bfloat16)
    mu_bf, lv_bf = covariate_prior_net(covariates, prepared_bf16)
    mu_bf, lv_bf = jax.block_until_ready((mu_bf, lv_bf))
    assert jnp.allclose(mu_bf, mu_ref, atol=1e-1, rtol=1e-1)
    assert jnp.allclose(lv_bf, lv_ref, atol=1e-1, rtol=1e-1)

    print("KERNEL_OK")
</pallas_src>

<mosaic_0001>
module attributes {stable_mosaic.version = 11 : i64} {
  func.func @_prior_net_kernel(%arg0: i32, %arg1: memref<16x512xf32, #tpu.memory_space<vmem>>, %arg2: memref<32x16xf32, #tpu.memory_space<vmem>>, %arg3: memref<32x1xf32, #tpu.memory_space<vmem>>, %arg4: memref<32x32xf32, #tpu.memory_space<vmem>>, %arg5: memref<32x1xf32, #tpu.memory_space<vmem>>, %arg6: memref<16x32xf32, #tpu.memory_space<vmem>>, %arg7: memref<16x1xf32, #tpu.memory_space<vmem>>, %arg8: memref<16x512xf32, #tpu.memory_space<vmem>>) attributes {dimension_semantics = [#tpu.dimension_semantics<parallel>], iteration_bounds = array<i64: 1>, scalar_prefetch = 0 : i64, scratch_operands = 0 : i64, tpu.core_type = #tpu.core_type<tc>, window_params = [{transform_indices = @transform_0, window_bounds = array<i64: 16, 512>}, {pipeline_mode = #tpu.pipeline_mode<synchronous>, transform_indices = @transform_1, window_bounds = array<i64: 32, 16>}, {pipeline_mode = #tpu.pipeline_mode<synchronous>, transform_indices = @transform_2, window_bounds = array<i64: 32, 1>}, {pipeline_mode = #tpu.pipeline_mode<synchronous>, transform_indices = @transform_3, window_bounds = array<i64: 32, 32>}, {pipeline_mode = #tpu.pipeline_mode<synchronous>, transform_indices = @transform_4, window_bounds = array<i64: 32, 1>}, {pipeline_mode = #tpu.pipeline_mode<synchronous>, transform_indices = @transform_5, window_bounds = array<i64: 16, 32>}, {pipeline_mode = #tpu.pipeline_mode<synchronous>, transform_indices = @transform_6, window_bounds = array<i64: 16, 1>}, {transform_indices = @transform_7, window_bounds = array<i64: 16, 512>}]} {
    %c0 = arith.constant 0 : index
    %c0_0 = arith.constant 0 : index
    %0 = vector.load %arg2[%c0, %c0_0] : memref<32x16xf32, #tpu.memory_space<vmem>>, vector<32x16xf32>
    %c0_1 = arith.constant 0 : index
    %c0_2 = arith.constant 0 : index
    %1 = vector.load %arg1[%c0_1, %c0_2] : memref<16x512xf32, #tpu.memory_space<vmem>>, vector<16x512xf32>
    %cst = arith.constant dense<0.000000e+00> : vector<32x512xf32>
    %2 = tpu.matmul %0, %1, %cst {dimension_numbers = #tpu.dot_dimension_numbers<[1], [0], [0], [1], [0, 0, 1, 1], [], []>} : vector<32x16xf32>, vector<16x512xf32>, vector<32x512xf32> -> vector<32x512xf32>
    %c0_3 = arith.constant 0 : index
    %c0_4 = arith.constant 0 : index
    %3 = vector.load %arg3[%c0_3, %c0_4] : memref<32x1xf32, #tpu.memory_space<vmem>>, vector<32x1xf32>
    %4 = vector.broadcast %3 : vector<32x1xf32> to vector<32x512xf32>
    %5 = arith.addf %2, %4 : vector<32x512xf32>
    %cst_5 = arith.constant 0.000000e+00 : f32
    %6 = vector.broadcast %cst_5 : f32 to vector<32x512xf32>
    %7 = arith.maximumf %5, %6 : vector<32x512xf32>
    %c0_6 = arith.constant 0 : index
    %c0_7 = arith.constant 0 : index
    %8 = vector.load %arg4[%c0_6, %c0_7] : memref<32x32xf32, #tpu.memory_space<vmem>>, vector<32x32xf32>
    %cst_8 = arith.constant dense<0.000000e+00> : vector<32x512xf32>
    %9 = tpu.matmul %8, %7, %cst_8 {dimension_numbers = #tpu.dot_dimension_numbers<[1], [0], [0], [1], [0, 0, 1, 1], [], []>} : vector<32x32xf32>, vector<32x512xf32>, vector<32x512xf32> -> vector<32x512xf32>
    %c0_9 = arith.constant 0 : index
    %c0_10 = arith.constant 0 : index
    %10 = vector.load %arg5[%c0_9, %c0_10] : memref<32x1xf32, #tpu.memory_space<vmem>>, vector<32x1xf32>
    %11 = vector.broadcast %10 : vector<32x1xf32> to vector<32x512xf32>
    %12 = arith.addf %9, %11 : vector<32x512xf32>
    %cst_11 = arith.constant 0.000000e+00 : f32
    %13 = vector.broadcast %cst_11 : f32 to vector<32x512xf32>
    %14 = arith.maximumf %12, %13 : vector<32x512xf32>
    %c0_12 = arith.constant 0 : index
    %c0_13 = arith.constant 0 : index
    %15 = vector.load %arg6[%c0_12, %c0_13] : memref<16x32xf32, #tpu.memory_space<vmem>>, vector<16x32xf32>
    %cst_14 = arith.constant dense<0.000000e+00> : vector<16x512xf32>
    %16 = tpu.matmul %15, %14, %cst_14 {dimension_numbers = #tpu.dot_dimension_numbers<[1], [0], [0], [1], [0, 0, 1, 1], [], []>} : vector<16x32xf32>, vector<32x512xf32>, vector<16x512xf32> -> vector<16x512xf32>
    %c0_15 = arith.constant 0 : index
    %c0_16 = arith.constant 0 : index
    %17 = vector.load %arg7[%c0_15, %c0_16] : memref<16x1xf32, #tpu.memory_space<vmem>>, vector<16x1xf32>
    %18 = vector.broadcast %17 : vector<16x1xf32> to vector<16x512xf32>
    %19 = arith.addf %16, %18 : vector<16x512xf32>
    %c0_17 = arith.constant 0 : index
    %c0_18 = arith.constant 0 : index
    %20 = vector.load %arg8[%c0_17, %c0_18] : memref<16x512xf32, #tpu.memory_space<vmem>>, vector<16x512xf32>
    tpu.vector_store %arg8[%c0_17, %c0_18], %19 {strides = array<i32>} : memref<16x512xf32, #tpu.memory_space<vmem>>, vector<16x512xf32>,
    return
  }
  func.func @transform_0(%arg0: i32) -> (i32, i32) {
    %c0_i32 = arith.constant 0 : i32
    %c0_i32_0 = arith.constant 0 : i32
    return %c0_i32, %arg0 : i32, i32
  }
  func.func @transform_1(%arg0: i32) -> (i32, i32) {
    %c0_i32 = arith.constant 0 : i32
    %c0_i32_0 = arith.constant 0 : i32
    %c0_i32_1 = arith.constant 0 : i32
    return %c0_i32, %c0_i32_0 : i32, i32
  }
  func.func @transform_2(%arg0: i32) -> (i32, i32) {
    %c0_i32 = arith.constant 0 : i32
    %c0_i32_0 = arith.constant 0 : i32
    %c0_i32_1 = arith.constant 0 : i32
    return %c0_i32, %c0_i32_0 : i32, i32
  }
  func.func @transform_3(%arg0: i32) -> (i32, i32) {
    %c0_i32 = arith.constant 0 : i32
    %c0_i32_0 = arith.constant 0 : i32
    %c0_i32_1 = arith.constant 0 : i32
    return %c0_i32, %c0_i32_0 : i32, i32
  }
  func.func @transform_4(%arg0: i32) -> (i32, i32) {
    %c0_i32 = arith.constant 0 : i32
    %c0_i32_0 = arith.constant 0 : i32
    %c0_i32_1 = arith.constant 0 : i32
    return %c0_i32, %c0_i32_0 : i32, i32
  }
  func.func @transform_5(%arg0: i32) -> (i32, i32) {
    %c0_i32 = arith.constant 0 : i32
    %c0_i32_0 = arith.constant 0 : i32
    %c0_i32_1 = arith.constant 0 : i32
    return %c0_i32, %c0_i32_0 : i32, i32
  }
  func.func @transform_6(%arg0: i32) -> (i32, i32) {
    %c0_i32 = arith.constant 0 : i32
    %c0_i32_0 = arith.constant 0 : i32
    %c0_i32_1 = arith.constant 0 : i32
    return %c0_i32, %c0_i32_0 : i32, i32
  }
  func.func @transform_7(%arg0: i32) -> (i32, i32) {
    %c0_i32 = arith.constant 0 : i32
    %c0_i32_0 = arith.constant 0 : i32
    return %c0_i32, %arg0 : i32, i32
  }
}

</mosaic_0001>

<bundles_post_ra>
// kernel: tpu_custom_call.1
= control target key start
LH: loop header
LB: loop body
LE: loop exit
PB: predicated region body
PF: predicated region fallthrough
CT: control target
= control target key end

     0   :  { %vm63_vm0 = vcmask 130048   ;;  %s763_s0 = inlined_call_operand.vmem [shape: f32[16,512], index: 0, kind: input, shape index: {}]   ;;  %s764_s1 = inlined_call_operand.vmem [shape: f32[32,16], index: 1, kind: input, shape index: {}]   ;;  %s765_s2 = inlined_call_operand.vmem [shape: f32[32,1], index: 2, kind: input, shape index: {}]   ;;  %s766_s3 = inlined_call_operand.vmem [shape: f32[32,32], index: 3, kind: input, shape index: {}]   ;;  %s767_s4 = inlined_call_operand.vmem [shape: f32[32,1], index: 4, kind: input, shape index: {}]   ;;  %s768_s5 = inlined_call_operand.vmem [shape: f32[16,32], index: 5, kind: input, shape index: {}]   ;;  %s769_s6 = inlined_call_operand.vmem [shape: f32[16,1], index: 6, kind: input, shape index: {}]   ;;  %s770_s7 = inlined_call_operand.hbm [shape: f32[16,512], index: 7, kind: output, shape index: {}]  }
   0x1   :  { %v35_v0 = vld [vmem:[%s763_s0 + $0x20] sm:$0xff]  ;;  %v36_v1 = vld [vmem:[%s763_s0 + $0x28] sm:$0xff]  ;;  %v37_v2 = vld [vmem:[%s763_s0 + $0x30] sm:$0xff] }
   0x2   :  { %90 = vmatpush.msra.mxu0 %v35_v0  ;;  %119 = vmatpush.msra.mxu1 %v36_v1  ;;  %v38_v3 = vld [vmem:[%s763_s0 + $0x38] sm:$0xff]  ;;  %v31_v4 = vld [vmem:[%s763_s0] sm:$0xff]  ;;  %v32_v5 = vld [vmem:[%s763_s0 + $0x8] sm:$0xff] }
   0x3   :  { %148 = vmatpush.msra.mxu2 %v37_v2  ;;  %177 = vmatpush.msra.mxu3 %v38_v3  ;;  %v33_v6 = vld [vmem:[%s763_s0 + $0x10] sm:$0xff]  ;;  %v34_v7 = vld [vmem:[%s763_s0 + $0x18] sm:$0xff]  ;;  %v27_v8 = vld [vmem:[%s764_s1] sm:$0xff] }
   0x4   :  { %91 = vmatpush.msra.mxu0 %v31_v4  ;;  %120 = vmatpush.msra.mxu1 %v32_v5  ;;  %v40_v9 = vld [vmem:[%s765_s2 + $0x8] sm:$0xff]  ;;  %v42_v10 = vld [vmem:[%s765_s2 + $0x18] sm:$0xff] }
   0x5   :  { %149 = vmatpush.msra.mxu2 %v33_v6  ;;  %178 = vmatpush.msra.mxu3 %v34_v7 }
   0x6   :  { %519 = vmatmul.msk.f32.vlgmr.msra.gmra.mxu0 %vm63_vm0, %v27_v8  ;;  %523 = vmatmul.msk.f32.vlgmr.msra.gmra.mxu1 %vm63_vm0, %v27_v8 }
   0x7   :  { %527 = vmatmul.msk.f32.vlgmr.msra.gmra.mxu2 %vm63_vm0, %v27_v8  ;;  %531 = vmatmul.msk.f32.vlgmr.msra.gmra.mxu3 %vm63_vm0, %v27_v8 }
   0x8   :  { %12 = vsyncpa [#allocation3], 0  ;;  %v592_v11 = vmov 0   ;;  %v28_v12 = vld [vmem:[%s764_s1 + $0x8] sm:$0xff]  ;;  %v39_v13 = vld [vmem:[%s765_s2] sm:$0xff]  ;;  %vm236_vm1 = vcmask 261120  }
   0x9   :  { %564 = vset.pattern.permute.xlu1 %v592_v11  ;;  %563 = vset.pattern.permute.xlu0 %v592_v11  ;;  %v41_v14 = vld [vmem:[%s765_s2 + $0x10] sm:$0xff]  ;;  %v213_v16 = vld [vmem:[%s767_s4 + $0x8] sm:$0xff]  ;;  %v212_v17 = vld [vmem:[%s767_s4] sm:$0xff]  ;;  %s507_s30 = sshll.u32 %s770_s7, 4  ;;  %s594_s8 = smov 512   ;;  %s508_s30 = int_to_ptr.hbm [resolvable:$true] %s507_s30 }
   0xa   :  { %50 = vperm.xlu1 %564, %v40_v9   ;;  %60 = vperm.xlu0 %563, %v42_v10   ;;  %v29_v15 = vld [vmem:[%s764_s1 + $0x10] sm:$0xff]  ;;  %v30_v18 = vld [vmem:[%s764_s1 + $0x18] sm:$0xff]  ;;  %v384_v19 = vld [vmem:[%s769_s6 + $0x8] sm:$0xff]  ;;  %s595_s9 = smov 32  }
   0xb   :  { %565 = vset.pattern.permute.xlu2 %v592_v11  ;;  %v208_v0 = vld [vmem:[%s766_s3] sm:$0xff]  ;;  %v215_v5 = vld [vmem:[%s767_s4 + $0x18] sm:$0xff]  ;;  %v209_v10 = vld [vmem:[%s766_s3 + $0x8] sm:$0xff] }
   0xc   :  { %233 = vperm.xlu2 %565, %v215_v5   ;;  %v214_v11 = vld [vmem:[%s767_s4 + $0x10] sm:$0xff] }
   0xe   :  { %520 = vmatmul.msk.f32.gmra.mxu0 %vm63_vm0, %v28_v12  ;;  %524 = vmatmul.msk.f32.gmra.mxu1 %vm63_vm0, %v28_v12 }
   0xf   :  { %528 = vmatmul.msk.f32.gmra.mxu2 %vm63_vm0, %v28_v12  ;;  %532 = vmatmul.msk.f32.gmra.mxu3 %vm63_vm0, %v28_v12  ;;  %v210_v12 = vld [vmem:[%s766_s3 + $0x10] sm:$0xff] }
  0x12   :  { %45 = vperm.xlu1 %564, %v39_v13   ;;  %55 = vperm.xlu0 %563, %v41_v14   ;;  %v383_v13 = vld [vmem:[%s769_s6] sm:$0xff]  ;;  %v211_v14 = vld [vmem:[%s766_s3 + $0x18] sm:$0xff] }
  0x14   :  { %228 = vperm.xlu2 %565, %v214_v11  }
  0x16   :  { %521 = vmatmul.msk.f32.gmra.mxu0 %vm63_vm0, %v29_v15  ;;  %525 = vmatmul.msk.f32.gmra.mxu1 %vm63_vm0, %v29_v15 }
  0x17   :  { %529 = vmatmul.msk.f32.gmra.mxu2 %vm63_vm0, %v29_v15  ;;  %533 = vmatmul.msk.f32.gmra.mxu3 %vm63_vm0, %v29_v15 }
  0x1a   :  { %223 = vperm.xlu0 %563, %v213_v16   ;;  %218 = vperm.xlu1 %564, %v212_v17  }
  0x1c   :  { %387 = vperm.xlu2 %565, %v383_v13  }
  0x1e   :  { %522 = vmatmul.msk.f32.gmra.mxu0 %vm63_vm0, %v30_v18  ;;  %526 = vmatmul.msk.f32.gmra.mxu1 %vm63_vm0, %v30_v18 }
  0x1f   :  { %530 = vmatmul.msk.f32.gmra.mxu2 %vm63_vm0, %v30_v18  ;;  %534 = vmatmul.msk.f32.gmra.mxu3 %vm63_vm0, %v30_v18 }
  0x22   :  { %392 = vperm.xlu0 %563, %v384_v19  }
  0x66   :  { %v234_v19 = vpop.permute.xlu2 %233 }
  0x7c   :  { %v61_v26 = vpop.permute.xlu0 %60  ;;  %v51_v31 = vpop.permute.xlu1 %50 }
  0x83   :  { %v93_v20 = vpop.f32.mrf.mxu0  ;;  %v122_v21 = vpop.f32.mrf.mxu1 }
  0x84   :  { %v56_v32 = vpop.permute.xlu0 %55  ;;  %v46_v45 = vpop.permute.xlu1 %45 }
  0x85   :  { %v94_v48 = vadd.f32 %v93_v20, %v46_v45  ;;  %v123_v49 = vadd.f32 %v122_v21, %v46_v45 }
  0x87   :  { %v192_v58 = vmax.f32 %v94_v48, 0.0  ;;  %v193_v59 = vmax.f32 %v123_v49, 0.0  ;;  %v381_v49 = vld [vmem:[%s768_s5] sm:$0xff] }
  0x8a   :  { %v151_v22 = vpop.f32.mrf.mxu2  ;;  %v180_v23 = vpop.f32.mrf.mxu3 }
  0x8b   :  { %v96_v24 = vpop.f32.mrf.mxu0  ;;  %v125_v25 = vpop.f32.mrf.mxu1  ;;  %v152_v1 = vadd.f32 %v151_v22, %v46_v45  ;;  %v181_v2 = vadd.f32 %v180_v23, %v46_v45 }
  0x8c   :  { %v97_v41 = vadd.f32 %v96_v24, %v51_v31  ;;  %v126_v42 = vadd.f32 %v125_v25, %v51_v31 }
  0x8d   :  { %v194_v8 = vmax.f32 %v152_v1, 0.0  ;;  %v195_v9 = vmax.f32 %v181_v2, 0.0 }
  0x8e   :  { %v196_v50 = vmax.f32 %v97_v41, 0.0  ;;  %v197_v51 = vmax.f32 %v126_v42, 0.0 }
  0x92   :  { %v154_v27 = vpop.f32.mrf.mxu2  ;;  %v183_v28 = vpop.f32.mrf.mxu3 }
  0x93   :  { %v99_v29 = vpop.f32.mrf.mxu0  ;;  %v128_v30 = vpop.f32.mrf.mxu1  ;;  %v155_v60 = vadd.f32 %v154_v27, %v51_v31  ;;  %v184_v61 = vadd.f32 %v183_v28, %v51_v31 }
  0x94   :  { %v100_v37 = vadd.f32 %v99_v29, %v56_v32  ;;  %v129_v38 = vadd.f32 %v128_v30, %v56_v32  ;;  %v224_v31 = vpop.permute.xlu0 %223 }
  0x95   :  { %v198_v6 = vmax.f32 %v155_v60, 0.0  ;;  %v199_v7 = vmax.f32 %v184_v61, 0.0 }
  0x96   :  { %v200_v46 = vmax.f32 %v100_v37, 0.0  ;;  %v201_v47 = vmax.f32 %v129_v38, 0.0 }
  0x9a   :  { %v157_v33 = vpop.f32.mrf.mxu2  ;;  %v186_v34 = vpop.f32.mrf.mxu3 }
  0x9b   :  { %v102_v35 = vpop.f32.mrf.mxu0  ;;  %v131_v36 = vpop.f32.mrf.mxu1  ;;  %v158_v54 = vadd.f32 %v157_v33, %v56_v32  ;;  %v187_v55 = vadd.f32 %v186_v34, %v56_v32 }
  0x9c   :  { %v103_v39 = vadd.f32 %v102_v35, %v61_v26  ;;  %v132_v40 = vadd.f32 %v131_v36, %v61_v26  ;;  %v219_v36 = vpop.permute.xlu1 %218 }
  0x9d   :  { %v202_v3 = vmax.f32 %v158_v54, 0.0  ;;  %v203_v4 = vmax.f32 %v187_v55, 0.0 }
  0x9e   :  { %v204_v43 = vmax.f32 %v103_v39, 0.0  ;;  %v205_v44 = vmax.f32 %v132_v40, 0.0 }
  0xa0   :  { %261 = vmatpush.msrb.mxu0 %v204_v43  ;;  %290 = vmatpush.msrb.mxu1 %v205_v44 }
  0xa2   :  { %v160_v52 = vpop.f32.mrf.mxu2  ;;  %v189_v53 = vpop.f32.mrf.mxu3  ;;  %262 = vmatpush.msrb.mxu0 %v200_v46  ;;  %291 = vmatpush.msrb.mxu1 %v201_v47 }
  0xa3   :  { %v161_v56 = vadd.f32 %v160_v52, %v61_v26  ;;  %v190_v57 = vadd.f32 %v189_v53, %v61_v26  ;;  %v229_v26 = vpop.permute.xlu2 %228 }
  0xa4   :  { %263 = vmatpush.msrb.mxu0 %v196_v50  ;;  %292 = vmatpush.msrb.mxu1 %v197_v51 }
  0xa5   :  { %v206_v62 = vmax.f32 %v161_v56, 0.0  ;;  %v207_v63 = vmax.f32 %v190_v57, 0.0 }
  0xa6   :  { %264 = vmatpush.msrb.mxu0 %v192_v58  ;;  %293 = vmatpush.msrb.mxu1 %v193_v59 }
  0xa7   :  { %319 = vmatpush.msrb.mxu2 %v206_v62  ;;  %348 = vmatpush.msrb.mxu3 %v207_v63 }
  0xa8   :  { %535 = vmatmul.msk.f32.vlgmr.msrb.gmra.mxu0 %vm236_vm1, %v208_v0  ;;  %539 = vmatmul.msk.f32.vlgmr.msrb.gmra.mxu1 %vm236_vm1, %v208_v0 }
  0xa9   :  { %320 = vmatpush.msrb.mxu2 %v202_v3  ;;  %349 = vmatpush.msrb.mxu3 %v203_v4 }
  0xab   :  { %321 = vmatpush.msrb.mxu2 %v198_v6  ;;  %350 = vmatpush.msrb.mxu3 %v199_v7  ;;  %v388_v5 = vpop.permute.xlu2 %387 }
  0xad   :  { %322 = vmatpush.msrb.mxu2 %v194_v8  ;;  %351 = vmatpush.msrb.mxu3 %v195_v9 }
  0xae   :  { %543 = vmatmul.msk.f32.vlgmr.msrb.gmra.mxu2 %vm236_vm1, %v208_v0  ;;  %547 = vmatmul.msk.f32.vlgmr.msrb.gmra.mxu3 %vm236_vm1, %v208_v0  ;;  %v382_v0 = vld [vmem:[%s768_s5 + $0x8] sm:$0xff]  ;;  %s593_s5 = smov [#allocation2]  }
  0xaf   :  { %s505_s27 = sshll.u32 %s593_s5, 4  ;;  %s506_s27 = int_to_ptr.vmem [resolvable:$true] %s505_s27 }
  0xb0   :  { %536 = vmatmul.msk.f32.gmra.mxu0 %vm236_vm1, %v209_v10  ;;  %540 = vmatmul.msk.f32.gmra.mxu1 %vm236_vm1, %v209_v10 }
  0xb6   :  { %544 = vmatmul.msk.f32.gmra.mxu2 %vm236_vm1, %v209_v10  ;;  %548 = vmatmul.msk.f32.gmra.mxu3 %vm236_vm1, %v209_v10  ;;  %v393_v10 = vpop.permute.xlu0 %392 }
  0xb8   :  { %537 = vmatmul.msk.f32.gmra.mxu0 %vm236_vm1, %v210_v12  ;;  %541 = vmatmul.msk.f32.gmra.mxu1 %vm236_vm1, %v210_v12 }
  0xbe   :  { %545 = vmatmul.msk.f32.gmra.mxu2 %vm236_vm1, %v210_v12  ;;  %549 = vmatmul.msk.f32.gmra.mxu3 %vm236_vm1, %v210_v12 }
  0xc0   :  { %538 = vmatmul.msk.f32.gmra.mxu0 %vm236_vm1, %v211_v14  ;;  %542 = vmatmul.msk.f32.gmra.mxu1 %vm236_vm1, %v211_v14 }
  0xc6   :  { %546 = vmatmul.msk.f32.gmra.mxu2 %vm236_vm1, %v211_v14  ;;  %550 = vmatmul.msk.f32.gmra.mxu3 %vm236_vm1, %v211_v14 }
 0x125   :  { %v266_v15 = vpop.f32.mrf.mxu0  ;;  %v295_v16 = vpop.f32.mrf.mxu1 }
 0x126   :  { %v267_v43 = vadd.f32 %v266_v15, %v219_v36  ;;  %v296_v44 = vadd.f32 %v295_v16, %v219_v36 }
 0x128   :  { %v365_v47 = vmax.f32 %v267_v43, 0.0  ;;  %v366_v48 = vmax.f32 %v296_v44, 0.0 }
 0x12d   :  { %v269_v17 = vpop.f32.mrf.mxu0  ;;  %v298_v18 = vpop.f32.mrf.mxu1 }
 0x12e   :  { %v270_v34 = vadd.f32 %v269_v17, %v224_v31  ;;  %v299_v35 = vadd.f32 %v298_v18, %v224_v31 }
 0x130   :  { %v369_v45 = vmax.f32 %v270_v34, 0.0  ;;  %v370_v46 = vmax.f32 %v299_v35, 0.0 }
 0x131   :  { %v324_v20 = vpop.f32.mrf.mxu2  ;;  %v353_v21 = vpop.f32.mrf.mxu3 }
 0x132   :  { %v325_v60 = vadd.f32 %v324_v20, %v219_v36  ;;  %v354_v61 = vadd.f32 %v353_v21, %v219_v36 }
 0x134   :  { %v367_v3 = vmax.f32 %v325_v60, 0.0  ;;  %v368_v4 = vmax.f32 %v354_v61, 0.0 }
 0x135   :  { %v272_v22 = vpop.f32.mrf.mxu0  ;;  %v301_v23 = vpop.f32.mrf.mxu1 }
 0x136   :  { %v273_v27 = vadd.f32 %v272_v22, %v229_v26  ;;  %v302_v28 = vadd.f32 %v301_v23, %v229_v26 }
 0x138   :  { %v373_v39 = vmax.f32 %v273_v27, 0.0  ;;  %v374_v40 = vmax.f32 %v302_v28, 0.0 }
 0x139   :  { %v327_v24 = vpop.f32.mrf.mxu2  ;;  %v356_v25 = vpop.f32.mrf.mxu3 }
 0x13a   :  { %v328_v56 = vadd.f32 %v327_v24, %v224_v31  ;;  %v357_v57 = vadd.f32 %v356_v25, %v224_v31 }
 0x13c   :  { %v371_v1 = vmax.f32 %v328_v56, 0.0  ;;  %v372_v2 = vmax.f32 %v357_v57, 0.0 }
 0x13d   :  { %v275_v29 = vpop.f32.mrf.mxu0  ;;  %v304_v30 = vpop.f32.mrf.mxu1 }
 0x13e   :  { %v276_v32 = vadd.f32 %v275_v29, %v234_v19  ;;  %v305_v33 = vadd.f32 %v304_v30, %v234_v19 }
 0x140   :  { %v377_v37 = vmax.f32 %v276_v32, 0.0  ;;  %v378_v38 = vmax.f32 %v305_v33, 0.0 }
 0x141   :  { %v330_v41 = vpop.f32.mrf.mxu2  ;;  %v359_v42 = vpop.f32.mrf.mxu3 }
 0x142   :  { %413 = vmatpush.msra.mxu0 %v377_v37  ;;  %436 = vmatpush.msra.mxu1 %v378_v38  ;;  %v331_v52 = vadd.f32 %v330_v41, %v229_v26  ;;  %v360_v53 = vadd.f32 %v359_v42, %v229_v26 }
 0x144   :  { %414 = vmatpush.msra.mxu0 %v373_v39  ;;  %437 = vmatpush.msra.mxu1 %v374_v40  ;;  %v375_v62 = vmax.f32 %v331_v52, 0.0  ;;  %v376_v63 = vmax.f32 %v360_v53, 0.0 }
 0x146   :  { %415 = vmatpush.msra.mxu0 %v369_v45  ;;  %438 = vmatpush.msra.mxu1 %v370_v46 }
 0x148   :  { %416 = vmatpush.msra.mxu0 %v365_v47  ;;  %439 = vmatpush.msra.mxu1 %v366_v48 }
 0x149   :  { %v333_v50 = vpop.f32.mrf.mxu2  ;;  %v362_v51 = vpop.f32.mrf.mxu3  ;;  %551 = vmatmul.msk.f32.vlgmr.msra.gmra.mxu0 %vm236_vm1, %v381_v49  ;;  %553 = vmatmul.msk.f32.vlgmr.msra.gmra.mxu1 %vm236_vm1, %v381_v49 }
 0x14a   :  { %v334_v54 = vadd.f32 %v333_v50, %v234_v19  ;;  %v363_v55 = vadd.f32 %v362_v51, %v234_v19 }
 0x14c   :  { %v379_v58 = vmax.f32 %v334_v54, 0.0  ;;  %v380_v59 = vmax.f32 %v363_v55, 0.0 }
 0x14e   :  { %459 = vmatpush.msra.mxu2 %v379_v58  ;;  %482 = vmatpush.msra.mxu3 %v380_v59 }
 0x150   :  { %460 = vmatpush.msra.mxu2 %v375_v62  ;;  %483 = vmatpush.msra.mxu3 %v376_v63 }
 0x151   :  { %552 = vmatmul.msk.f32.gmra.mxu0 %vm236_vm1, %v382_v0  ;;  %554 = vmatmul.msk.f32.gmra.mxu1 %vm236_vm1, %v382_v0 }
 0x152   :  { %461 = vmatpush.msra.mxu2 %v371_v1  ;;  %484 = vmatpush.msra.mxu3 %v372_v2 }
 0x154   :  { %462 = vmatpush.msra.mxu2 %v367_v3  ;;  %485 = vmatpush.msra.mxu3 %v368_v4 }
 0x155   :  { %555 = vmatmul.msk.f32.vlgmr.msra.gmra.mxu2 %vm236_vm1, %v381_v49  ;;  %557 = vmatmul.msk.f32.vlgmr.msra.gmra.mxu3 %vm236_vm1, %v381_v49 }
 0x15d   :  { %556 = vmatmul.msk.f32.gmra.mxu2 %vm236_vm1, %v382_v0  ;;  %558 = vmatmul.msk.f32.gmra.mxu3 %vm236_vm1, %v382_v0 }
 0x1c6   :  { %v418_v6 = vpop.f32.mrf.mxu0  ;;  %v441_v7 = vpop.f32.mrf.mxu1 }
 0x1c7   :  { %v419_v8 = vadd.f32 %v418_v6, %v388_v5  ;;  %v442_v9 = vadd.f32 %v441_v7, %v388_v5 }
 0x1c9   :  { %493 = vst [vmem:[#allocation2] sm:$0xff] %v419_v8 }
 0x1ca   :  { %494 = vst [vmem:[#allocation2 + $0x8] sm:$0xff] %v442_v9 }
 0x1ce   :  { %v421_v11 = vpop.f32.mrf.mxu0  ;;  %v444_v12 = vpop.f32.mrf.mxu1 }
 0x1cf   :  { %v422_v13 = vadd.f32 %v421_v11, %v393_v10  ;;  %v445_v14 = vadd.f32 %v444_v12, %v393_v10 }
 0x1d1   :  { %497 = vst [vmem:[#allocation2 + $0x20] sm:$0xff] %v422_v13 }
 0x1d2   :  { %498 = vst [vmem:[#allocation2 + $0x28] sm:$0xff] %v445_v14 }
 0x1d8   :  { %v464_v15 = vpop.f32.mrf.mxu2  ;;  %v487_v16 = vpop.f32.mrf.mxu3 }
 0x1d9   :  { %v465_v17 = vadd.f32 %v464_v15, %v388_v5  ;;  %v488_v18 = vadd.f32 %v487_v16, %v388_v5 }
 0x1db   :  { %495 = vst [vmem:[#allocation2 + $0x10] sm:$0xff] %v465_v17 }
 0x1dc   :  { %496 = vst [vmem:[#allocation2 + $0x18] sm:$0xff] %v488_v18 }
 0x1e0   :  { %v467_v19 = vpop.f32.mrf.mxu2  ;;  %v490_v20 = vpop.f32.mrf.mxu3 }
 0x1e1   :  { %v468_v21 = vadd.f32 %v467_v19, %v393_v10  ;;  %v491_v22 = vadd.f32 %v490_v20, %v393_v10 }
 0x1e3   :  { %499 = vst [vmem:[#allocation2 + $0x30] sm:$0xff] %v468_v21 }
 0x1e4   :  { %500 = vst [vmem:[#allocation2 + $0x38] sm:$0xff] %v491_v22 }
 0x1e5   :  { %513 = dma.vmem_to_hbm [thread:$0]  %s506_s27, 1024, %s508_s30, [#allocation3], %s594_s8, %s594_s8, %s595_s9  }
 0x1e6   :  { %590 = dma.done.wait [#allocation3], 1024  }
 0x1e7   :  { %591 = vsyncadd [#allocation3], 4294966272 }
 0x1e8   :  { %518 = vsyncpa [#allocation3], 1 }

</bundles_post_ra>
